<compile_context>
chip_gen: v5e
topology: v5e:2x2
jax: 0.10.0
libtpu: 0.0.40
codegen_flags: <defaults>
</compile_context>

<pallas_src>
import functools

import jax
import jax.numpy as jnp
from jax import lax
from jax.experimental import pallas as pl
from jax.experimental.pallas import tpu as pltpu


# --------------------------------------------------------------------------
# helpers
# --------------------------------------------------------------------------
def _round_up(v, m):
    return ((v + m - 1) // m) * m


def _cdiv(a, b):
    return -(-a // b)


def _vmem_capacity_bytes():
    try:
        return int(pltpu.get_tpu_info().vmem_capacity_bytes)
    except Exception:
        return 64 * 1024 * 1024  # conservative (v7x per-TC) fallback


def _vmem_limit_bytes(vmem_cap):
    # Explicit scoped limit well above the 32 MiB default but with headroom:
    # ~48 MiB on a 64 MiB v7x TensorCore, ~96 MiB on v5e/v6e.
    return int(min(int(vmem_cap * 0.75), 96 * 1024 * 1024))


def _auto_tile_n(vmem_limit, T, F, sH, s_grp, d_grp, dyn_bytes):
    """Largest node tile that keeps the pipeline inside the scoped VMEM limit.

    Only the blocks Pallas double-buffers are counted twice; in-kernel
    intermediates once; resident (constant index_map) weights subtracted.
    """
    pipelined = (T * F * 4                       # x tile (f32)
                 + 2 * sH * 4 + 2 * 4            # mu_o / mu_t / 2 KL scalars
                 + T * d_grp * dyn_bytes)        # dyn output block
    once = (F * 4 + s_grp * 4                    # xm, zs
            + T * F * 2                          # in-kernel bf16 x copy
            + 3 * T * d_grp * 4)                 # zd + activation temporaries
    resident = 2 * (F * s_grp * 4 + s_grp * 4 + F * d_grp * 2 + d_grp * 4)
    budget = int(vmem_limit * 0.8) - resident
    tile = budget // (2 * pipelined + once)
    tile = max(8, min(4096, tile))
    return (tile // 8) * 8


def _choose_tiling(N, tile_n, tile_max):
    if tile_n is not None:
        tile_n = max(8, (int(tile_n) // 8) * 8)
        return tile_n, _cdiv(N, tile_n)
    # Auto: >= 2 grid steps (even) so both v7x TensorCores get work, while
    # balancing the tile size to minimise node padding waste.
    n_tiles = max(2, _cdiv(N, tile_max))
    if n_tiles % 2:
        n_tiles += 1
    tile_n = max(8, _round_up(_cdiv(N, n_tiles), 8))
    return tile_n, n_tiles


# --------------------------------------------------------------------------
# fused kernel: static Gaussian-IB heads on the temporally-meaned x (f32) and
# dynamic per-(node,timestep) heads via one bf16 MXU matmul.
# --------------------------------------------------------------------------
def _ddgib_kernel(x_ref, w_s_ref, b_s_ref, w_d_ref, b_d_ref,
                  org_ref, oth_ref, klot_ref, klto_ref, dyn_ref,
                  *, s_hidden, d_hidden):
    tile_n, t_steps, f_in = x_ref.shape
    sH, dH = s_hidden, d_hidden

    x = x_ref[...]                                          # (tile_n, T, F) f32

    # ------------- static branch: mean over T first, f32 matmul -----------
    xm = jnp.mean(x, axis=1)                                # (tile_n, F)
    zs = jnp.dot(xm, w_s_ref[...], preferred_element_type=jnp.float32)
    zs = zs + b_s_ref[...]                                  # (tile_n, s_grp)
    mu_o = zs[:, 0:sH]
    lv_o = zs[:, sH:2 * sH]
    mu_t = zs[:, 2 * sH:3 * sH]
    lv_t = zs[:, 3 * sH:4 * sH]
    d2 = (mu_o - mu_t) * (mu_o - mu_t)
    dlv = lv_o - lv_t
    # division-free symmetric KL (EUP exponentials); clamps are cheap
    # insurance against f32 overflow for pathological log-variance gaps.
    klot = (-dlv + jnp.exp(jnp.clip(dlv, -80.0, 80.0))
            + d2 * jnp.exp(jnp.clip(-lv_t, -80.0, 80.0)) - 1.0)
    klto = (dlv + jnp.exp(jnp.clip(-dlv, -80.0, 80.0))
            + d2 * jnp.exp(jnp.clip(-lv_o, -80.0, 80.0)) - 1.0)
    org_ref[...] = mu_o
    oth_ref[...] = mu_t
    # in-kernel lane reduction (XLU) -> per-node scalars, no wrapper pass.
    klot_ref[...] = 0.5 * jnp.sum(klot, axis=-1, keepdims=True)
    klto_ref[...] = 0.5 * jnp.sum(klto, axis=-1, keepdims=True)

    # ------------- dynamic branch: bf16 MXU over all node-timesteps -------
    xf = x.reshape(tile_n * t_steps, f_in).astype(jnp.bfloat16)
    zd = jnp.dot(xf, w_d_ref[...], preferred_element_type=jnp.float32)
    zd = zd + b_d_ref[...]                                  # (tile_n*T, d_grp)
    lane = lax.broadcasted_iota(jnp.int32, zd.shape, 1)
    act = jnp.where(
        lane < dH, jnp.tanh(zd),
        jnp.where(lane < 2 * dH, zd,
                  jnp.where(lane < 3 * dH,
                            jax.nn.softplus(zd) + 1e-6, 0.0)))
    dyn_ref[...] = act.astype(dyn_ref.dtype)                # one lane-dense store


# --------------------------------------------------------------------------
# wrapper
# --------------------------------------------------------------------------
def ddgib_forward(x, params, tile_n=None, dyn_out_dtype=jnp.float32):
    N, T, F = x.shape
    sH = params["w_static"].shape[1] // 4
    dH = params["w_dyn"].shape[1] // 3
    s_grp = _round_up(4 * sH, 128)
    d_grp = _round_up(3 * dH, 128)
    dyn_bytes = jnp.dtype(dyn_out_dtype).itemsize

    vmem_cap = _vmem_capacity_bytes()
    vmem_limit = _vmem_limit_bytes(vmem_cap)
    tile_max = _auto_tile_n(vmem_limit, T, F, sH, s_grp, d_grp, dyn_bytes)
    tile_n, n_tiles = _choose_tiling(N, tile_n, tile_max)
    n_pad = tile_n * n_tiles

    # Weights packed tight; only the whole group is padded to a 128-lane
    # boundary.  Static stays f32 (precision of the KL heads), dynamic bf16.
    w_s = jnp.pad(params["w_static"],
                  ((0, 0), (0, s_grp - 4 * sH))).astype(jnp.float32)
    b_s = jnp.pad(params["b_static"],
                  ((0, 0), (0, s_grp - 4 * sH))).astype(jnp.float32)
    w_d = jnp.pad(params["w_dyn"],
                  ((0, 0), (0, d_grp - 3 * dH))).astype(jnp.bfloat16)
    b_d = jnp.pad(params["b_dyn"],
                  ((0, 0), (0, d_grp - 3 * dH))).astype(jnp.float32)

    # x is passed as f32 and cast to bf16 inside the kernel; only pad the
    # node axis when the tiling actually needs it.
    x_in = x
    if n_pad != N:
        x_in = jnp.pad(x, ((0, n_pad - N), (0, 0), (0, 0)))

    kernel = functools.partial(_ddgib_kernel, s_hidden=sH, d_hidden=dH)

    cost = pl.CostEstimate(
        flops=int(2 * n_pad * F * s_grp + 2 * n_pad * T * F * d_grp),
        transcendentals=int(3 * n_pad * T * d_grp + 4 * n_pad * sH),
        bytes_accessed=int(
            n_pad * T * F * 4
            + F * (s_grp * 4 + d_grp * 2) + (s_grp + d_grp) * 4
            + n_pad * (2 * sH + 2) * 4
            + n_pad * T * d_grp * dyn_bytes),
    )

    outs = pl.pallas_call(
        kernel,
        grid=(n_tiles,),
        in_specs=[
            pl.BlockSpec((tile_n, T, F), lambda i: (i, 0, 0)),
            pl.BlockSpec((F, s_grp), lambda i: (0, 0)),        # resident
            pl.BlockSpec((1, s_grp), lambda i: (0, 0)),        # resident
            pl.BlockSpec((F, d_grp), lambda i: (0, 0)),        # resident
            pl.BlockSpec((1, d_grp), lambda i: (0, 0)),        # resident
        ],
        out_specs=(
            pl.BlockSpec((tile_n, sH), lambda i: (i, 0)),
            pl.BlockSpec((tile_n, sH), lambda i: (i, 0)),
            pl.BlockSpec((tile_n, 1), lambda i: (i, 0)),
            pl.BlockSpec((tile_n, 1), lambda i: (i, 0)),
            pl.BlockSpec((tile_n * T, d_grp), lambda i: (i, 0)),
        ),
        out_shape=(
            jax.ShapeDtypeStruct((n_pad, sH), jnp.float32),
            jax.ShapeDtypeStruct((n_pad, sH), jnp.float32),
            jax.ShapeDtypeStruct((n_pad, 1), jnp.float32),
            jax.ShapeDtypeStruct((n_pad, 1), jnp.float32),
            jax.ShapeDtypeStruct((n_pad * T, d_grp), dyn_out_dtype),
        ),
        compiler_params=pltpu.CompilerParams(
            dimension_semantics=("parallel",),
            vmem_limit_bytes=vmem_limit,
        ),
        cost_estimate=cost,
    )(x_in, w_s, b_s, w_d, b_d)

    sta_org_o, sta_other_o, klot_o, klto_o, dyn_slab = outs
    sta_org = sta_org_o[:N]
    sta_other = sta_other_o[:N]
    sta_kl_o_t = klot_o[:N, 0]
    sta_kl_t_o = klto_o[:N, 0]

    dyn_full = dyn_slab.reshape(n_pad, T, d_grp)[:N]
    dyn = dyn_full[:, :, 0:dH]
    dyn_club = dyn_full[:, :, dH:2 * dH]
    dyn_rho = dyn_full[:, :, 2 * dH:3 * dH]

    # Same return-tuple order as the PyTorch forward.
    return sta_org, sta_other, sta_kl_o_t, sta_kl_t_o, dyn_rho, dyn_club, dyn


# --------------------------------------------------------------------------
# pure-JAX reference (f32, mean-pool-then-linear, divide-based KL)
# --------------------------------------------------------------------------
def ddgib_reference(x, params):
    N, T, F = x.shape
    sH = params["w_static"].shape[1] // 4
    dH = params["w_dyn"].shape[1] // 3
    xs = jnp.mean(x, axis=1)
    z = xs @ params["w_static"] + params["b_static"]
    mu_o, lv_o = z[:, 0:sH], z[:, sH:2 * sH]
    mu_t, lv_t = z[:, 2 * sH:3 * sH], z[:, 3 * sH:4 * sH]
    var_o, var_t = jnp.exp(lv_o), jnp.exp(lv_t)
    d2 = (mu_o - mu_t) ** 2
    kl_ot = 0.5 * jnp.sum(lv_t - lv_o + (var_o + d2) / var_t - 1.0, axis=-1)
    kl_to = 0.5 * jnp.sum(lv_o - lv_t + (var_t + d2) / var_o - 1.0, axis=-1)
    zf = x.reshape(N * T, F) @ params["w_dyn"] + params["b_dyn"]
    dyn = jnp.tanh(zf[:, 0:dH]).reshape(N, T, dH)
    club = zf[:, dH:2 * dH].reshape(N, T, dH)
    rho = (jax.nn.softplus(zf[:, 2 * dH:3 * dH]) + 1e-6).reshape(N, T, dH)
    return mu_o, mu_t, kl_ot, kl_to, rho, club, dyn


def init_params(in_features, s_hidden, d_hidden, seed=42):
    k = jax.random.PRNGKey(seed)
    k1, k2, k3, k4 = jax.random.split(k, 4)
    scale = 1.0 / jnp.sqrt(jnp.float32(in_features))
    return {
        "w_static": jax.random.normal(k1, (in_features, 4 * s_hidden),
                                      jnp.float32) * scale,
        "b_static": jax.random.normal(k2, (1, 4 * s_hidden),
                                      jnp.float32) * 0.01,
        "w_dyn": jax.random.normal(k3, (in_features, 3 * d_hidden),
                                   jnp.float32) * scale,
        "b_dyn": jax.random.normal(k4, (1, 3 * d_hidden),
                                   jnp.float32) * 0.01,
    }


if __name__ == "__main__":
    N, T, F_IN = 20, 8, 16        # nodes, timesteps, input features
    S_HIDDEN = 32                 # matches Blinear(n_h=32) / s_hidden
    D_HIDDEN = 32                 # d_hidden

    x = jax.random.normal(jax.random.PRNGKey(0), (N, T, F_IN), jnp.float32)
    params = init_params(F_IN, S_HIDDEN, D_HIDDEN)

    # tile_n=8 forces a real multi-tile grid (+ node padding path) at demo size.
    outs = ddgib_forward(x, params, tile_n=8)
    outs = jax.block_until_ready(outs)

    sta_org, sta_other, sta_kl_o_t, sta_kl_t_o, dyn_rho, dyn_club, dyn = outs
    assert sta_org.shape == (N, S_HIDDEN)
    assert sta_other.shape == (N, S_HIDDEN)
    assert sta_kl_o_t.shape == (N,)
    assert sta_kl_t_o.shape == (N,)
    assert dyn.shape == (N, T, D_HIDDEN)
    assert dyn_club.shape == (N, T, D_HIDDEN)
    assert dyn_rho.shape == (N, T, D_HIDDEN)
    assert bool(jnp.all(dyn_rho > 0.0))

    # numeric check vs pure-f32 reference (dyn matmul runs in bf16)
    refs = ddgib_reference(x, params)
    for name, got, ref in zip(
            ("sta_org", "sta_other", "kl_ot", "kl_to", "rho", "club", "dyn"),
            outs, refs):
        assert jnp.allclose(got, ref, rtol=5e-2, atol=5e-2), name

    # auto-tiling path (even >=2-step grid for v7x megacore) must agree.
    outs_auto = jax.block_until_ready(ddgib_forward(x, params))
    for name, a, b in zip(
            ("sta_org", "sta_other", "kl_ot", "kl_to", "rho", "club", "dyn"),
            outs, outs_auto):
        assert jnp.allclose(a, b, rtol=1e-3, atol=1e-3), name

    print("KERNEL_OK")
</pallas_src>

<mosaic_0001>
module attributes {stable_mosaic.version = 11 : i64} {
  func.func @_ddgib_kernel(%arg0: i32, %arg1: memref<8x8x16xf32, #tpu.memory_space<vmem>>, %arg2: memref<16x128xf32, #tpu.memory_space<vmem>>, %arg3: memref<1x128xf32, #tpu.memory_space<vmem>>, %arg4: memref<16x128xbf16, #tpu.memory_space<vmem>>, %arg5: memref<1x128xf32, #tpu.memory_space<vmem>>, %arg6: memref<8x32xf32, #tpu.memory_space<vmem>>, %arg7: memref<8x32xf32, #tpu.memory_space<vmem>>, %arg8: memref<8x1xf32, #tpu.memory_space<vmem>>, %arg9: memref<8x1xf32, #tpu.memory_space<vmem>>, %arg10: memref<64x128xf32, #tpu.memory_space<vmem>>) attributes {dimension_semantics = [#tpu.dimension_semantics<parallel>], iteration_bounds = array<i64: 3>, scalar_prefetch = 0 : i64, scratch_operands = 0 : i64, tpu.core_type = #tpu.core_type<tc>, window_params = [{transform_indices = @transform_0, window_bounds = array<i64: 8, 8, 16>}, {pipeline_mode = #tpu.pipeline_mode<synchronous>, transform_indices = @transform_1, window_bounds = array<i64: 16, 128>}, {pipeline_mode = #tpu.pipeline_mode<synchronous>, transform_indices = @transform_2, window_bounds = array<i64: 1, 128>}, {pipeline_mode = #tpu.pipeline_mode<synchronous>, transform_indices = @transform_3, window_bounds = array<i64: 16, 128>}, {pipeline_mode = #tpu.pipeline_mode<synchronous>, transform_indices = @transform_4, window_bounds = array<i64: 1, 128>}, {transform_indices = @transform_5, window_bounds = array<i64: 8, 32>}, {transform_indices = @transform_6, window_bounds = array<i64: 8, 32>}, {transform_indices = @transform_7, window_bounds = array<i64: 8, 1>}, {transform_indices = @transform_8, window_bounds = array<i64: 8, 1>}, {transform_indices = @transform_9, window_bounds = array<i64: 64, 128>}]} {
    %c0 = arith.constant 0 : index
    %c0_0 = arith.constant 0 : index
    %c0_1 = arith.constant 0 : index
    %0 = vector.load %arg1[%c0, %c0_0, %c0_1] : memref<8x8x16xf32, #tpu.memory_space<vmem>>, vector<8x8x16xf32>
    %cst = arith.constant dense<0.000000e+00> : vector<8x16xf32>
    %1 = vector.multi_reduction <add>, %0, %cst [1] : vector<8x8x16xf32> to vector<8x16xf32>
    %cst_2 = arith.constant 8.000000e+00 : f32
    %2 = vector.broadcast %cst_2 : f32 to vector<8x16xf32>
    %3 = arith.divf %1, %2 : vector<8x16xf32>
    %c0_3 = arith.constant 0 : index
    %c0_4 = arith.constant 0 : index
    %4 = vector.load %arg2[%c0_3, %c0_4] : memref<16x128xf32, #tpu.memory_space<vmem>>, vector<16x128xf32>
    %cst_5 = arith.constant dense<0.000000e+00> : vector<8x128xf32>
    %5 = tpu.matmul %3, %4, %cst_5 {dimension_numbers = #tpu.dot_dimension_numbers<[1], [0], [0], [1], [0, 0, 1, 1], [], []>} : vector<8x16xf32>, vector<16x128xf32>, vector<8x128xf32> -> vector<8x128xf32>
    %c0_6 = arith.constant 0 : index
    %c0_7 = arith.constant 0 : index
    %6 = vector.load %arg3[%c0_6, %c0_7] : memref<1x128xf32, #tpu.memory_space<vmem>>, vector<1x128xf32>
    %7 = vector.broadcast %6 : vector<1x128xf32> to vector<8x128xf32>
    %8 = arith.addf %5, %7 : vector<8x128xf32>
    %9 = vector.extract_strided_slice %8 {offsets = [0, 0], sizes = [8, 32], strides = [1, 1]} : vector<8x128xf32> to vector<8x32xf32>
    %10 = vector.extract_strided_slice %8 {offsets = [0, 32], sizes = [8, 32], strides = [1, 1]} : vector<8x128xf32> to vector<8x32xf32>
    %11 = vector.extract_strided_slice %8 {offsets = [0, 64], sizes = [8, 32], strides = [1, 1]} : vector<8x128xf32> to vector<8x32xf32>
    %12 = vector.extract_strided_slice %8 {offsets = [0, 96], sizes = [8, 32], strides = [1, 1]} : vector<8x128xf32> to vector<8x32xf32>
    %13 = arith.subf %9, %11 : vector<8x32xf32>
    %14 = arith.subf %9, %11 : vector<8x32xf32>
    %15 = arith.mulf %13, %14 : vector<8x32xf32>
    %16 = arith.subf %10, %12 : vector<8x32xf32>
    %cst_8 = arith.constant 0.000000e+00 : f32
    %17 = vector.broadcast %cst_8 : f32 to vector<8x32xf32>
    %18 = arith.subf %17, %16 : vector<8x32xf32>
    %cst_9 = arith.constant -8.000000e+01 : f32
    %cst_10 = arith.constant 8.000000e+01 : f32
    %19 = vector.broadcast %cst_9 : f32 to vector<8x32xf32>
    %20 = arith.maximumf %19, %16 : vector<8x32xf32>
    %21 = vector.broadcast %cst_10 : f32 to vector<8x32xf32>
    %22 = arith.minimumf %21, %20 : vector<8x32xf32>
    %23 = math.exp %22 : vector<8x32xf32>
    %24 = arith.addf %18, %23 : vector<8x32xf32>
    %cst_11 = arith.constant 0.000000e+00 : f32
    %25 = vector.broadcast %cst_11 : f32 to vector<8x32xf32>
    %26 = arith.subf %25, %12 : vector<8x32xf32>
    %cst_12 = arith.constant -8.000000e+01 : f32
    %cst_13 = arith.constant 8.000000e+01 : f32
    %27 = vector.broadcast %cst_12 : f32 to vector<8x32xf32>
    %28 = arith.maximumf %27, %26 : vector<8x32xf32>
    %29 = vector.broadcast %cst_13 : f32 to vector<8x32xf32>
    %30 = arith.minimumf %29, %28 : vector<8x32xf32>
    %31 = math.exp %30 : vector<8x32xf32>
    %32 = arith.mulf %15, %31 : vector<8x32xf32>
    %33 = arith.addf %24, %32 : vector<8x32xf32>
    %cst_14 = arith.constant 1.000000e+00 : f32
    %34 = vector.broadcast %cst_14 : f32 to vector<8x32xf32>
    %35 = arith.subf %33, %34 : vector<8x32xf32>
    %cst_15 = arith.constant 0.000000e+00 : f32
    %36 = vector.broadcast %cst_15 : f32 to vector<8x32xf32>
    %37 = arith.subf %36, %16 : vector<8x32xf32>
    %cst_16 = arith.constant -8.000000e+01 : f32
    %cst_17 = arith.constant 8.000000e+01 : f32
    %38 = vector.broadcast %cst_16 : f32 to vector<8x32xf32>
    %39 = arith.maximumf %38, %37 : vector<8x32xf32>
    %40 = vector.broadcast %cst_17 : f32 to vector<8x32xf32>
    %41 = arith.minimumf %40, %39 : vector<8x32xf32>
    %42 = math.exp %41 : vector<8x32xf32>
    %43 = arith.addf %16, %42 : vector<8x32xf32>
    %cst_18 = arith.constant 0.000000e+00 : f32
    %44 = vector.broadcast %cst_18 : f32 to vector<8x32xf32>
    %45 = arith.subf %44, %10 : vector<8x32xf32>
    %cst_19 = arith.constant -8.000000e+01 : f32
    %cst_20 = arith.constant 8.000000e+01 : f32
    %46 = vector.broadcast %cst_19 : f32 to vector<8x32xf32>
    %47 = arith.maximumf %46, %45 : vector<8x32xf32>
    %48 = vector.broadcast %cst_20 : f32 to vector<8x32xf32>
    %49 = arith.minimumf %48, %47 : vector<8x32xf32>
    %50 = math.exp %49 : vector<8x32xf32>
    %51 = arith.mulf %15, %50 : vector<8x32xf32>
    %52 = arith.addf %43, %51 : vector<8x32xf32>
    %cst_21 = arith.constant 1.000000e+00 : f32
    %53 = vector.broadcast %cst_21 : f32 to vector<8x32xf32>
    %54 = arith.subf %52, %53 : vector<8x32xf32>
    %c0_22 = arith.constant 0 : index
    %c0_23 = arith.constant 0 : index
    %55 = vector.load %arg6[%c0_22, %c0_23] : memref<8x32xf32, #tpu.memory_space<vmem>>, vector<8x32xf32>
    tpu.vector_store %arg6[%c0_22, %c0_23], %9 {strides = array<i32>} : memref<8x32xf32, #tpu.memory_space<vmem>>, vector<8x32xf32>,
    %c0_24 = arith.constant 0 : index
    %c0_25 = arith.constant 0 : index
    %56 = vector.load %arg7[%c0_24, %c0_25] : memref<8x32xf32, #tpu.memory_space<vmem>>, vector<8x32xf32>
    tpu.vector_store %arg7[%c0_24, %c0_25], %11 {strides = array<i32>} : memref<8x32xf32, #tpu.memory_space<vmem>>, vector<8x32xf32>,
    %cst_26 = arith.constant dense<0.000000e+00> : vector<8xf32>
    %57 = vector.multi_reduction <add>, %35, %cst_26 [1] : vector<8x32xf32> to vector<8xf32>
    %58 = vector.shape_cast %57 : vector<8xf32> to vector<8x1xf32>
    %cst_27 = arith.constant 5.000000e-01 : f32
    %59 = vector.broadcast %cst_27 : f32 to vector<8x1xf32>
    %60 = arith.mulf %59, %58 : vector<8x1xf32>
    %c0_28 = arith.constant 0 : index
    %c0_29 = arith.constant 0 : index
    %61 = vector.load %arg8[%c0_28, %c0_29] : memref<8x1xf32, #tpu.memory_space<vmem>>, vector<8x1xf32>
    tpu.vector_store %arg8[%c0_28, %c0_29], %60 {strides = array<i32>} : memref<8x1xf32, #tpu.memory_space<vmem>>, vector<8x1xf32>,
    %cst_30 = arith.constant dense<0.000000e+00> : vector<8xf32>
    %62 = vector.multi_reduction <add>, %54, %cst_30 [1] : vector<8x32xf32> to vector<8xf32>
    %63 = vector.shape_cast %62 : vector<8xf32> to vector<8x1xf32>
    %cst_31 = arith.constant 5.000000e-01 : f32
    %64 = vector.broadcast %cst_31 : f32 to vector<8x1xf32>
    %65 = arith.mulf %64, %63 : vector<8x1xf32>
    %c0_32 = arith.constant 0 : index
    %c0_33 = arith.constant 0 : index
    %66 = vector.load %arg9[%c0_32, %c0_33] : memref<8x1xf32, #tpu.memory_space<vmem>>, vector<8x1xf32>
    tpu.vector_store %arg9[%c0_32, %c0_33], %65 {strides = array<i32>} : memref<8x1xf32, #tpu.memory_space<vmem>>, vector<8x1xf32>,
    %67 = vector.shape_cast %0 : vector<8x8x16xf32> to vector<64x16xf32>
    %68 = arith.truncf %67 : vector<64x16xf32> to vector<64x16xbf16>
    %c0_34 = arith.constant 0 : index
    %c0_35 = arith.constant 0 : index
    %69 = vector.load %arg4[%c0_34, %c0_35] : memref<16x128xbf16, #tpu.memory_space<vmem>>, vector<16x128xbf16>
    %cst_36 = arith.constant dense<0.000000e+00> : vector<64x128xf32>
    %70 = tpu.matmul %68, %69, %cst_36 {dimension_numbers = #tpu.dot_dimension_numbers<[1], [0], [0], [1], [0, 0, 1, 1], [], []>} : vector<64x16xbf16>, vector<16x128xbf16>, vector<64x128xf32> -> vector<64x128xf32>
    %c0_37 = arith.constant 0 : index
    %c0_38 = arith.constant 0 : index
    %71 = vector.load %arg5[%c0_37, %c0_38] : memref<1x128xf32, #tpu.memory_space<vmem>>, vector<1x128xf32>
    %72 = vector.broadcast %71 : vector<1x128xf32> to vector<64x128xf32>
    %73 = arith.addf %70, %72 : vector<64x128xf32>
    %74 = tpu.iota {dimensions = array<i32: 1>} : vector<64x128xi32>
    %c32_i32 = arith.constant 32 : i32
    %75 = vector.broadcast %c32_i32 : i32 to vector<64x128xi32>
    %76 = arith.cmpi slt, %74, %75 : vector<64x128xi32>
    %77 = math.tanh %73 : vector<64x128xf32>
    %c64_i32 = arith.constant 64 : i32
    %78 = vector.broadcast %c64_i32 : i32 to vector<64x128xi32>
    %79 = arith.cmpi slt, %74, %78 : vector<64x128xi32>
    %c96_i32 = arith.constant 96 : i32
    %80 = vector.broadcast %c96_i32 : i32 to vector<64x128xi32>
    %81 = arith.cmpi slt, %74, %80 : vector<64x128xi32>
    %cst_39 = arith.constant 0.000000e+00 : f32
    %82 = vector.broadcast %cst_39 : f32 to vector<64x128xf32>
    %83 = arith.maximumf %73, %82 : vector<64x128xf32>
    %84 = vector.broadcast %cst_39 : f32 to vector<64x128xf32>
    %85 = arith.subf %73, %84 : vector<64x128xf32>
    %86 = arith.cmpf one, %85, %85 : vector<64x128xf32>
    %87 = vector.broadcast %cst_39 : f32 to vector<64x128xf32>
    %88 = arith.addf %73, %87 : vector<64x128xf32>
    %89 = math.absf %85 : vector<64x128xf32>
    %cst_40 = arith.constant 0.000000e+00 : f32
    %90 = vector.broadcast %cst_40 : f32 to vector<64x128xf32>
    %91 = arith.subf %90, %89 : vector<64x128xf32>
    %92 = math.exp %91 : vector<64x128xf32>
    %93 = math.log1p %92 : vector<64x128xf32>
    %94 = arith.addf %83, %93 : vector<64x128xf32>
    %95 = arith.select %86, %88, %94 : vector<64x128xi1>, vector<64x128xf32>
    %cst_41 = arith.constant 9.99999997E-7 : f32
    %96 = vector.broadcast %cst_41 : f32 to vector<64x128xf32>
    %97 = arith.addf %95, %96 : vector<64x128xf32>
    %cst_42 = arith.constant 0.000000e+00 : f32
    %98 = vector.broadcast %cst_42 : f32 to vector<64x128xf32>
    %99 = arith.select %81, %97, %98 : vector<64x128xi1>, vector<64x128xf32>
    %100 = arith.select %79, %73, %99 : vector<64x128xi1>, vector<64x128xf32>
    %101 = arith.select %76, %77, %100 : vector<64x128xi1>, vector<64x128xf32>
    %c0_43 = arith.constant 0 : index
    %c0_44 = arith.constant 0 : index
    %102 = vector.load %arg10[%c0_43, %c0_44] : memref<64x128xf32, #tpu.memory_space<vmem>>, vector<64x128xf32>
    tpu.vector_store %arg10[%c0_43, %c0_44], %101 {strides = array<i32>} : memref<64x128xf32, #tpu.memory_space<vmem>>, vector<64x128xf32>,
    return
  }
  func.func @transform_0(%arg0: i32) -> (i32, i32, i32) {
    %c0_i32 = arith.constant 0 : i32
    %c0_i32_0 = arith.constant 0 : i32
    %c0_i32_1 = arith.constant 0 : i32
    return %arg0, %c0_i32, %c0_i32_0 : i32, i32, i32
  }
  func.func @transform_1(%arg0: i32) -> (i32, i32) {
    %c0_i32 = arith.constant 0 : i32
    %c0_i32_0 = arith.constant 0 : i32
    %c0_i32_1 = arith.constant 0 : i32
    return %c0_i32, %c0_i32_0 : i32, i32
  }
  func.func @transform_2(%arg0: i32) -> (i32, i32) {
    %c0_i32 = arith.constant 0 : i32
    %c0_i32_0 = arith.constant 0 : i32
    %c0_i32_1 = arith.constant 0 : i32
    return %c0_i32, %c0_i32_0 : i32, i32
  }
  func.func @transform_3(%arg0: i32) -> (i32, i32) {
    %c0_i32 = arith.constant 0 : i32
    %c0_i32_0 = arith.constant 0 : i32
    %c0_i32_1 = arith.constant 0 : i32
    return %c0_i32, %c0_i32_0 : i32, i32
  }
  func.func @transform_4(%arg0: i32) -> (i32, i32) {
    %c0_i32 = arith.constant 0 : i32
    %c0_i32_0 = arith.constant 0 : i32
    %c0_i32_1 = arith.constant 0 : i32
    return %c0_i32, %c0_i32_0 : i32, i32
  }
  func.func @transform_5(%arg0: i32) -> (i32, i32) {
    %c0_i32 = arith.constant 0 : i32
    %c0_i32_0 = arith.constant 0 : i32
    return %arg0, %c0_i32 : i32, i32
  }
  func.func @transform_6(%arg0: i32) -> (i32, i32) {
    %c0_i32 = arith.constant 0 : i32
    %c0_i32_0 = arith.constant 0 : i32
    return %arg0, %c0_i32 : i32, i32
  }
  func.func @transform_7(%arg0: i32) -> (i32, i32) {
    %c0_i32 = arith.constant 0 : i32
    %c0_i32_0 = arith.constant 0 : i32
    return %arg0, %c0_i32 : i32, i32
  }
  func.func @transform_8(%arg0: i32) -> (i32, i32) {
    %c0_i32 = arith.constant 0 : i32
    %c0_i32_0 = arith.constant 0 : i32
    return %arg0, %c0_i32 : i32, i32
  }
  func.func @transform_9(%arg0: i32) -> (i32, i32) {
    %c0_i32 = arith.constant 0 : i32
    %c0_i32_0 = arith.constant 0 : i32
    return %arg0, %c0_i32 : i32, i32
  }
}

</mosaic_0001>

<bundles_post_ra>
// kernel: tpu_custom_call.1
= control target key start
LH: loop header
LB: loop body
LE: loop exit
PB: predicated region body
PF: predicated region fallthrough
CT: control target
= control target key end

     0   :  { %s1836_s0 = inlined_call_operand.vmem [shape: f32[24,8,16], index: 0, kind: input, shape index: {}]   ;;  %s1837_s1 = inlined_call_operand.vmem [shape: f32[16,128], index: 1, kind: input, shape index: {}]   ;;  %s1838_s2 = inlined_call_operand.vmem [shape: f32[1,128], index: 2, kind: input, shape index: {}]   ;;  %s1839_s3 = inlined_call_operand.vmem [shape: bf16[16,128], index: 3, kind: input, shape index: {}]   ;;  %s1840_s4 = inlined_call_operand.vmem [shape: f32[1,128], index: 4, kind: input, shape index: {}]   ;;  %s1841_s5 = inlined_call_operand.hbm [shape: f32[24,32], index: 5, kind: output, shape index: {0}]   ;;  %s1842_s6 = inlined_call_operand.hbm [shape: f32[24,32], index: 6, kind: output, shape index: {1}]   ;;  %s1843_s7 = inlined_call_operand.vmem [shape: f32[24,1], index: 7, kind: output, shape index: {2}]   ;;  %s1844_s8 = inlined_call_operand.vmem [shape: f32[24,1], index: 8, kind: output, shape index: {3}]   ;;  %s1845_s9 = inlined_call_operand.hbm [shape: f32[192,128], index: 9, kind: output, shape index: {4}]  }
   0x1   :  { %1847 = sst [smem:[#allocation9_spill]] %s1836_s0 }
   0x2   :  { %1848 = sst [smem:[#allocation10_spill]] %s1837_s1 }
   0x3   :  { %1849 = sst [smem:[#allocation11_spill]] %s1838_s2 }
   0x4   :  { %1850 = sst [smem:[#allocation12_spill]] %s1839_s3 }
   0x5   :  { %1851 = sst [smem:[#allocation13_spill]] %s1842_s6 }
   0x6   :  { %15 = vsyncpa [#allocation3], 0 }
   0x7   :  { %17 = vsyncpa [#allocation3 + $0x1], 0 }
   0x8   :  { %18 = vsyncpa [#allocation5], 0 }
   0x9   :  { %20 = vsyncpa [#allocation5 + $0x1], 0  ;;  %s1395_s30 = smov 0   ;;  %s1397_s10 = smov 0  }
   0xa   :  { %s1399_s11 = smov 0   ;;  %s1401_s12 = smov 0  }
   0xb LB: > { %s1416_s13 = sadd.s32 4294967295, %s1337_s12   ;;  %s1846_s14 = sadd.s32 4294967294, %s1337_s12   ;;  %s1337_s12 = sphi %s1401_s12, %s1877_s12   ;;  %s1333_s11 = sphi %s1399_s11, %s1876_s11   ;;  %s1329_s10 = sphi %s1397_s10, %s1875_s10   ;;  %s1325_s30 = sphi %s1395_s30, %s1874_s30  }
   0xc   : > { %s1420_s15 = sadd.s32 1, %s1337_s12   ;;  %s143_s16 = sadd.s32 1, %s1333_s11 }
   0xd   : > { %s140_s17 = ssub.s32 %s1337_s12, %s1420_s15  ;;  %p153_p0 = scmp.ne.s32.totalorder %s1333_s11, %s1329_s10 }
   0xe   : > { %p141_p1 = scmp.eq.s32.totalorder %s140_s17, 0  ;;  %p154_p2 = scmp.eq.s32.totalorder %s1416_s13, 2 }
   0xf   : > { %p159_p3 = scmp.ne.s32.totalorder %s1329_s10, %s1325_s30  ;;  %p160_p4 = scmp.eq.s32.totalorder %s1846_s14, 2 }
  0x10   : > { %s1433_s18 = scalar_select %p141_p1, %s1333_s11, %s143_s16  }
  0x11   : > { %p1435_p5 = por %p154_p2, %p153_p0  ;;  %p1439_p6 = por %p160_p4, %p159_p3 }
  0x12   : > { %p1066_p7 = scmp.ge.s32.totalorder %s1337_s12, 1  ;;  %p303_p8 = scmp.lt.s32.totalorder %s1337_s12, 4 }
  0x14   : > { %p304_p9 = pnand %p1066_p7, %p303_p8 }
  0x15   : > { %s1854_s1 = sld [smem:[#allocation10_spill]] (!%p304_p9)  ;;  %s1452_s25 = sshll.u32 (!%p304_p9), %s1416_s13, 3 }
  0x16   : > { %307 = sbr.rel (%p304_p9) target bundleno = 648 (0x288), region = 40  ;;  %p358_p10 = scmp.lt.s32.totalorder (!%p304_p9), %s1452_s25, 23 }
  0x17   : > { %s1855_s0 = sld [smem:[#allocation9_spill]] (!%p304_p9)  ;;  %s1493_s17 = sand.u32 (!%p304_p9), 1, %s1329_s10  }
  0x18   : > { %s1856_s2 = sld [smem:[#allocation11_spill]] (!%p304_p9)  ;;  %s1067_s23 = sshll.u32 (!%p304_p9), %s1493_s17, 3 }
  0x19   : > { %s1340_s24 = smov (!%p304_p9), 64   ;;  %s1342_s28 = smov (!%p304_p9), 32  }
  0x1a   : > { %s1504_s29 = scalar_lea.vmem (!%p304_p9), [#allocation4], %s1067_s23  ;;  %s1857_s3 = sld [smem:[#allocation12_spill]] (!%p304_p9) }
  0x1b   : > { %v454_v0 = vld [vmem:[%s1854_s1 + $0x8] sm:$0xff]  ;;  %v453_v1 = vld [vmem:[%s1854_s1] sm:$0xff]  ;;  %s359_s26 = scalar_select %p358_p10, %s1452_s25, 23  ;;  %vm381_vm0 = vcmask 130048   ;;  %v1339_v11 = vmov 8.0   ;;  %vm467_vm2 = vcmask 1041409  }
  0x1c   : > { %497 = vmatpush.msra.mxu0 %v454_v0  ;;  %1159 = vrcp.f32 %v1339_v11  ;;  %vm469_vm3 = vcmask 1042434   ;;  %vm471_vm4 = vcmask 1043459   ;;  %vm473_vm5 = vcmask 1044484   ;;  %s1858_s6 = sld [smem:[#allocation13_spill]] }
  0x1d   : > { %s1071_s27 = sshll.u32 %s359_s26, 3  ;;  %vm475_vm6 = vcmask 1045509   ;;  %vm477_vm7 = vcmask 1046534   ;;  %vm479_vm8 = vcmask 1047559   ;;  %vm546_vm9 = vcmask 261120   ;;  %s1499_s26 = scalar_lea.vmem [#allocation2], %s1067_s23 }
  0x1e   : > { %498 = vmatpush.msra.mxu0 %v453_v1  ;;  %s361_s16 = scalar_lea.vmem %s1855_s0, %s1071_s27  ;;  %s1341_s27 = smov 96  }
  0x1f   : > { %v1459_v2 = vld [vmem:[%s361_s16] sm:$0xff]  ;;  %v1461_v3 = vld [vmem:[%s361_s16 + $0x8] sm:$0xff]  ;;  %v1463_v4 = vld [vmem:[%s361_s16 + $0x10] sm:$0xff] }
  0x20   : > { %v1465_v5 = vld [vmem:[%s361_s16 + $0x18] sm:$0xff]  ;;  %v1467_v6 = vld [vmem:[%s361_s16 + $0x20] sm:$0xff]  ;;  %v1469_v7 = vld [vmem:[%s361_s16 + $0x28] sm:$0xff]  ;;  %v382_v8 = vsel %vm381_vm0, %v1459_v2, 0.0  ;;  %v389_v9 = vsel %vm381_vm0, %v1461_v3, 0.0  ;;  %v396_v10 = vsel %vm381_vm0, %v1463_v4, 0.0 }
  0x21   : > { %v1477_v12 = vld [vmem:[%s361_s16 + $0x30] sm:$0xff]  ;;  %v1479_v13 = vld [vmem:[%s361_s16 + $0x38] sm:$0xff]  ;;  %v383_v14 = vrot.slane %v382_v8, 4  ;;  %v390_v15 = vrot.slane %v389_v9, 4  ;;  %v397_v16 = vrot.slane %v396_v10, 4  ;;  %v403_v17 = vsel %vm381_vm0, %v1465_v5, 0.0 }
  0x22   : > { %v404_v18 = vrot.slane %v403_v17, 4  ;;  %v410_v19 = vsel %vm381_vm0, %v1467_v6, 0.0  ;;  %v417_v20 = vsel %vm381_vm0, %v1469_v7, 0.0  ;;  %v424_v21 = vsel %vm381_vm0, %v1477_v12, 0.0  ;;  %v1160_v34 = vpop.eup %1159  ;;  %s867_s16 = sshll.u32 %s1504_s29, 4  ;;  %s868_s16 = int_to_ptr.vmem [resolvable:$true] %s867_s16 }
  0x23   : > { %v384_v22 = vadd.f32 %v383_v14, %v382_v8  ;;  %v391_v23 = vadd.f32 %v390_v15, %v389_v9  ;;  %v398_v24 = vadd.f32 %v397_v16, %v396_v10  ;;  %v411_v25 = vrot.slane %v410_v19, 4 }
  0x24   : > { %v405_v26 = vadd.f32 %v404_v18, %v403_v17  ;;  %v418_v27 = vrot.slane %v417_v20, 4  ;;  %v425_v28 = vrot.slane %v424_v21, 4  ;;  %v431_v29 = vsel %vm381_vm0, %v1479_v13, 0.0 }
  0x25   : > { %v385_v30 = vrot.slane %v384_v22, 2  ;;  %v392_v31 = vrot.slane %v391_v23, 2  ;;  %v399_v32 = vrot.slane %v398_v24, 2  ;;  %v412_v33 = vadd.f32 %v411_v25, %v410_v19 }
  0x26   : > { %v406_v35 = vrot.slane %v405_v26, 2  ;;  %v419_v36 = vadd.f32 %v418_v27, %v417_v20  ;;  %v426_v37 = vadd.f32 %v425_v28, %v424_v21  ;;  %v432_v38 = vrot.slane %v431_v29, 4 }
  0x27   : > { %v413_v39 = vrot.slane %v412_v33, 2  ;;  %v386_v42 = vadd.f32 %v385_v30, %v384_v22  ;;  %v393_v44 = vadd.f32 %v392_v31, %v391_v23  ;;  %v400_v45 = vadd.f32 %v399_v32, %v398_v24  ;;  %v1157_v32 = vld [vmem:[%s1856_s2] ss:$0 sm:$0xff] }
  0x28   : > { %v420_v40 = vrot.slane %v419_v36, 2  ;;  %v433_v41 = vadd.f32 %v432_v38, %v431_v29  ;;  %v427_v43 = vrot.slane %v426_v37, 2  ;;  %v407_v46 = vadd.f32 %v406_v35, %v405_v26 }
  0x29   : > { %v414_v48 = vadd.f32 %v413_v39, %v412_v33  ;;  %v439_v52 = vmul.f32 8.0, %v1160_v34  ;;  %v387_v53 = vrot.slane %v386_v42, 1  ;;  %v394_v54 = vrot.slane %v393_v44, 1 }
  0x2a   : > { %v434_v47 = vrot.slane %v433_v41, 2  ;;  %v421_v49 = vadd.f32 %v420_v40, %v419_v36  ;;  %v428_v50 = vadd.f32 %v427_v43, %v426_v37  ;;  %v401_v55 = vrot.slane %v400_v45, 1 }
  0x2b   : > { %v408_v56 = vrot.slane %v407_v46, 1  ;;  %v415_v57 = vrot.slane %v414_v48, 1  ;;  %v440_v58 = vsub.f32 1.0, %v439_v52  ;;  %vm443_vm1 = vweird.f32 %v1160_v34 }
  0x2c   : > { %v435_v51 = vadd.f32 %v434_v47, %v433_v41  ;;  %v422_v59 = vrot.slane %v421_v49, 1  ;;  %v429_v60 = vrot.slane %v428_v50, 1  ;;  %v388_v63 = vadd.f32 %v387_v53, %v386_v42 }
  0x2d   : > { %v441_v62 = vmul.f32 %v1160_v34, %v440_v58  ;;  %v395_v0 = vadd.f32 %v394_v54, %v393_v44  ;;  %v402_v1 = vadd.f32 %v401_v55, %v400_v45  ;;  %v409_v8 = vadd.f32 %v408_v56, %v407_v46  ;;  %v1097_v46 = vld [vmem:[%s1857_s3] sm:$0xff]  ;;  %s1235_s3 = scalar_lea.hbm %s1858_s6, 24 }
  0x2e   : > { %v436_v61 = vrot.slane %v435_v51, 1  ;;  %v416_v9 = vadd.f32 %v415_v57, %v414_v48  ;;  %v423_v11 = vadd.f32 %v422_v59, %v421_v49  ;;  %v430_v14 = vadd.f32 %v429_v60, %v428_v50  ;;  %1100 = vmatpush.bf16.msra.mxu2 %v1097_v46  ;;  %1101 = vmatpush.bf16.msra.mxu3 %v1097_v46 }
  0x2f   : > { %v442_v10 = vadd.f32 %v1160_v34, %v441_v62  ;;  %v570_v47 = vpack.c.bf16 %v1469_v7, %v1467_v6  ;;  %v571_v48 = vpack.c.bf16 %v1479_v13, %v1477_v12  ;;  %603 = vmatpush.bf16.msrb.mxu0 %v1097_v46  ;;  %1099 = vmatpush.bf16.msra.mxu1 %v1097_v46 }
  0x30   : > { %v437_v15 = vadd.f32 %v436_v61, %v435_v51  ;;  %v568_v53 = vpack.c.bf16 %v1461_v3, %v1459_v2  ;;  %v569_v6 = vpack.c.bf16 %v1465_v5, %v1463_v4 }
  0x31   : > { %v444_v16 = vsel %vm443_vm1, %v1160_v34, %v442_v10  ;;  %1086 = vmatmul.msk.bf16.vlgmr.msra.gmra.mxu2 %vm381_vm0, %v570_v47  ;;  %1087 = vmatmul.msk.bf16.vlgmr.msra.gmra.mxu3 %vm381_vm0, %v571_v48 }
  0x32   : > { %v445_v17 = vmul.f32 %v444_v16, %v388_v63  ;;  %v446_v18 = vmul.f32 %v444_v16, %v395_v0  ;;  %v447_v19 = vmul.f32 %v444_v16, %v402_v1  ;;  %v448_v20 = vmul.f32 %v444_v16, %v409_v8  ;;  %1085 = vmatmul.msk.bf16.vlgmr.msra.gmra.mxu1 %vm381_vm0, %v569_v6 }
  0x33   : > { %v449_v21 = vmul.f32 %v444_v16, %v416_v9  ;;  %v450_v22 = vmul.f32 %v444_v16, %v423_v11  ;;  %v451_v24 = vmul.f32 %v444_v16, %v430_v14  ;;  %v452_v26 = vmul.f32 %v444_v16, %v437_v15 }
  0x34   : > { %v468_v23 = vsel %vm467_vm2, %v446_v18, %v445_v17 }
  0x35   : > { %v470_v25 = vsel %vm469_vm3, %v447_v19, %v468_v23 }
  0x36   : > { %v472_v27 = vsel %vm471_vm4, %v448_v20, %v470_v25 }
  0x37   : > { %v474_v28 = vsel %vm473_vm5, %v449_v21, %v472_v27 }
  0x38   : > { %v476_v29 = vsel %vm475_vm6, %v450_v22, %v474_v28 }
  0x39   : > { %v478_v30 = vsel %vm477_vm7, %v451_v24, %v476_v29 }
  0x3a   : > { %v480_v31 = vsel %vm479_vm8, %v452_v26, %v478_v30 }
  0x3b   : > { %1074 = vmatmul.msk.f32.vlgmr.msra.gmra.mxu0 %vm381_vm0, %v480_v31 }
  0x43   : > { %1084 = vmatmul.msk.bf16.vlgmr.msrb.gmra.mxu0 %vm381_vm0, %v568_v53 }
  0xb8   : > { %v500_v33 = vpop.f32.mrf.mxu0 }
  0xb9   : > { %v501_v34 = vadd.f32 %v1157_v32, %v500_v33 }
  0xbb   : > { %504 = vrot.lane.b32.xlu0 %v501_v34, %s1340_s24  ;;  %v515_v35 = vsub.f32 0.0, %v501_v34  ;;  %547 = vst.msk [vmem:[%s1499_s26] sm:$0xff] %vm546_vm9, %v501_v34  ;;  %s865_s24 = scalar_lea.hbm %s1858_s6, %s1452_s25 }
  0xbc   : > { %s869_s21 = sshll.u32 %s865_s24, 4  ;;  %s870_s21 = int_to_ptr.hbm [resolvable:$true] %s869_s21 }
  0xbd   : > { %v1076_v36 = vclamps-f32 %v515_v35, 80.0  ;;  %s1229_s0 = sshra.s32 %s870_s21, 4  ;;  %s1230_s0 = int_to_ptr.hbm [resolvable:$true] %s1229_s0 }
  0xbe   : > { %s1231_s1 = scalar_lea.hbm %s1230_s0, 8  ;;  %p1236_p0 = scmp.lt.s32.totalorder %s1230_s0, %s1858_s6 }
  0xbf   : > { %v518_v37 = vmul.f32 1.442695, %v1076_v36  ;;  %p1232_p11 = scmp.ne.s32.totalorder %s1230_s0, %s1231_s1  ;;  %p1237_p1 = scmp.lt.s32.totalorder %s1235_s3, %s1231_s1 }
  0xc1   : > { %1161 = vpow2.f32 %v518_v37  ;;  %p1233_p12 = pnand %p1232_p11, %p1435_p5  ;;  %p1238_p2 = por %p1237_p1, %p1236_p0 }
  0xc3   : > { %p1234_p13 = pneg %p1233_p12 }
  0xc5   : > { %p1239_p3 = pnand %p1238_p2, %p1234_p13 }
  0xc7   : > { %v1162_v38 = vpop.eup %1161 }
  0xc8   : > { %536 = vrot.lane.b32.xlu1 %v1162_v38, %s1341_s27  ;;  %521 = vrot.lane.b32.xlu0 %v1162_v38, %s1342_s28 }
 0x12d   : > { %v505_v39 = vpop.permute.xlu0 %504 }
 0x12e   : > { %548 = vst.msk [vmem:[%s1504_s29] sm:$0xff] %vm546_vm9, %v505_v39  ;;  %v507_v40 = vsub.f32 %v501_v34, %v505_v39 }
 0x130   : > { %v508_v41 = vmul.f32 %v507_v40, %v507_v40  ;;  %v509_v49 = vsub.f32 0.0, %v507_v40  ;;  %v1075_v55 = vclamps-f32 %v507_v40, 80.0 }
 0x132   : > { %v1078_v50 = vclamps-f32 %v509_v49, 80.0  ;;  %v512_v56 = vmul.f32 1.442695, %v1075_v55 }
 0x134   : > { %v533_v51 = vmul.f32 1.442695, %v1078_v50 }
 0x136   : > { %1163 = vpow2.f32 %v533_v51 }
 0x137   : > { %1165 = vpow2.f32 %v512_v56 }
 0x13a   : > { %v537_v42 = vpop.permute.xlu1 %536  ;;  %v522_v43 = vpop.permute.xlu0 %521 }
 0x13b   : > { %v539_v44 = vmul.f32 %v537_v42, %v508_v41  ;;  %v524_v45 = vmul.f32 %v522_v43, %v508_v41 }
 0x13c   : > { %v1164_v52 = vpop.eup %1163 }
 0x13d   : > { %541 = vrot.lane.b32.xlu2 %v539_v44, %s1342_s28  ;;  %526 = vrot.lane.b32.xlu1 %v524_v45, %s1342_s28  ;;  %v535_v7 = vadd.f32 %v1164_v52, %v507_v40  ;;  %v1166_v2 = vpop.eup %1165  ;;  %s827_s28 = sand.u32 1, %s1416_s13  }
 0x13e   : > { %v514_v3 = vadd.f32 %v1166_v2, %v509_v49  ;;  %s1531_s14 = scalar_lea.sflag [#allocation5], %s827_s28 }
 0x197   : > { %v542_v12 = vpop.permute.xlu2 %541 }
 0x198   : > { %v544_v13 = vadd.f32 %v542_v12, %v535_v7 }
 0x19a   : > { %v1079_v54 = vadd.f32 -1.0, %v544_v13 }
 0x19c   : > { %560 = vrot.lane.b32.xlu0 %v1079_v54, %s1341_s27 }
 0x1af   : > { %v527_v4 = vpop.permute.xlu1 %526 }
 0x1b0   : > { %v529_v5 = vadd.f32 %v527_v4, %v514_v3 }
 0x1b2   : > { %v1077_v57 = vadd.f32 -1.0, %v529_v5 }
 0x1b4   : > { %550 = vrot.lane.b32.xlu2 %v1077_v57, %s1341_s27 }
 0x1b5   : > { %1242 = shalt.err (!%p1239_p3)
}
 0x1b6   : > { %1103 = dma.vmem_to_hbm [thread:$0]  (%p1435_p5), %s868_s16, 128, %s870_s21, %s1531_s14  }
 0x1b7   : > { %s851_s2 = scalar_lea.hbm %s1841_s5, %s1452_s25  ;;  %s853_s28 = sshll.u32 %s1499_s26, 4  ;;  %s854_s28 = int_to_ptr.vmem [resolvable:$true] %s853_s28 }
 0x1b8   : > { %s855_s27 = sshll.u32 %s851_s2, 4  ;;  %s823_s0 = scalar_lea.sflag [#allocation3], %s1493_s17  ;;  %s856_s27 = int_to_ptr.hbm [resolvable:$true] %s855_s27 }
 0x1b9   : > { %s1257_s1 = sshra.s32 %s856_s27, 4  ;;  %s1263_s16 = scalar_lea.hbm %s1841_s5, 24  ;;  %s1258_s1 = int_to_ptr.hbm [resolvable:$true] %s1257_s1 }
 0x1ba   : > { %s1259_s3 = scalar_lea.hbm %s1258_s1, 8  ;;  %p1264_p9 = scmp.lt.s32.totalorder %s1258_s1, %s1841_s5 }
 0x1bb   : > { %p1260_p4 = scmp.ne.s32.totalorder %s1258_s1, %s1259_s3  ;;  %p1265_p10 = scmp.lt.s32.totalorder %s1263_s16, %s1259_s3 }
 0x1bd   : > { %p1261_p7 = pnand %p1260_p4, %p1435_p5  ;;  %p1266_p11 = por %p1265_p10, %p1264_p9 }
 0x1bf   : > { %p1262_p8 = pneg %p1261_p7 }
 0x1c1   : > { %p1267_p12 = pnand %p1266_p11, %p1262_p8 }
 0x1c3   : > { %1270 = shalt.err (!%p1267_p12)
}
 0x1c4   : > { %1102 = dma.vmem_to_hbm [thread:$0]  (%p1435_p5), %s854_s28, 128, %s856_s27, %s823_s0   ;;  %v1158_v62 = vld [vmem:[%s1840_s4] ss:$0 sm:$0xff]  ;;  %v605_v63 = vpop.f32.mrf.mxu0  ;;  %v610_v0 = vpop.f32.mrf.mxu1  ;;  %v625_v21 = vlaneseq }
 0x1c5   : > { %v1565_v1 = vadd.f32 %v1158_v62, %v605_v63  ;;  %v615_v8 = vpop.f32.mrf.mxu2  ;;  %v1568_v10 = vadd.f32 %v1158_v62, %v610_v0  ;;  %v620_v14 = vpop.f32.mrf.mxu3  ;;  %s1069_s6 = sshll.u32 %s1493_s17, 6  ;;  %s1098_s29 = sshll.u32 %s1416_s13, 6 }
 0x1c6   : > { %v1571_v17 = vadd.f32 %v1158_v62, %v615_v8  ;;  %v1575_v24 = vadd.f32 %v1158_v62, %v620_v14  ;;  %v1587_v34 = vand.u32 127, %v625_v21  ;;  %s1683_s17 = scalar_lea.vmem [#allocation6], %s1069_s6  ;;  %s886_s28 = scalar_lea.hbm %s1845_s9, %s1098_s29 }
 0x1c7   : > { %v662_v9 = vand.u32 2147483647, %v1565_v1  ;;  %v664_v15 = vand.u32 2147483647, %v1568_v10  ;;  %v638_v35 = vmax.f32 %v1565_v1, 0.0  ;;  %v640_v38 = vmax.f32 %v1568_v10, 0.0 }
 0x1c8   : > { %v666_v22 = vand.u32 2147483647, %v1571_v17  ;;  %v668_v29 = vand.u32 2147483647, %v1575_v24  ;;  %v642_v39 = vmax.f32 %v1571_v17, 0.0  ;;  %v644_v52 = vmax.f32 %v1575_v24, 0.0 }
 0x1c9   : > { %v670_v11 = vsub.f32 0.0, %v662_v9  ;;  %v672_v18 = vsub.f32 0.0, %v664_v15  ;;  %vm646_vm10 = vcmp.ne.f32.partialorder %v1565_v1, %v1565_v1  ;;  %vm637_vm11 = vcmp.lt.s32.totalorder %v1587_v34, 96  ;;  %s887_s27 = sshll.u32 %s1683_s17, 4  ;;  %s889_s0 = sshll.u32 %s886_s28, 4  ;;  %s888_s27 = int_to_ptr.vmem [resolvable:$true] %s887_s27  ;;  %s890_s0 = int_to_ptr.hbm [resolvable:$true] %s889_s0 }
 0x1ca   : > { %v674_v27 = vsub.f32 0.0, %v666_v22  ;;  %v676_v36 = vsub.f32 0.0, %v668_v29  ;;  %vm648_vm12 = vcmp.ne.f32.partialorder %v1568_v10, %v1568_v10  ;;  %vm636_vm13 = vcmp.lt.s32.totalorder %v1587_v34, 64  ;;  %s1285_s1 = sshra.s32 %s890_s0, 4  ;;  %s1291_s16 = scalar_lea.hbm %s1845_s9, 192  ;;  %s1286_s1 = int_to_ptr.hbm [resolvable:$true] %s1285_s1 }
 0x1cb   : > { %v678_v16 = vmul.f32 1.442695, %v670_v11  ;;  %v682_v23 = vmul.f32 1.442695, %v672_v18  ;;  %vm627_vm15 = vcmp.lt.s32.totalorder %v1587_v34, 32  ;;  %vm650_vm1 = vcmp.ne.f32.partialorder %v1571_v17, %v1571_v17  ;;  %s1287_s3 = scalar_lea.hbm %s1286_s1, 64  ;;  %p1292_p2 = scmp.lt.s32.totalorder %s1286_s1, %s1845_s9 }
 0x1cc   : > { %v607_v19 = vpop.f32.mrf.mxu0  ;;  %v612_v20 = vpop.f32.mrf.mxu1  ;;  %v686_v30 = vmul.f32 1.442695, %v674_v27  ;;  %v690_v45 = vmul.f32 1.442695, %v676_v36  ;;  %vm652_vm3 = vcmp.ne.f32.partialorder %v1575_v24, %v1575_v24  ;;  %p1288_p13 = scmp.ne.s32.totalorder %s1286_s1, %s1287_s3  ;;  %p1293_p3 = scmp.lt.s32.totalorder %s1291_s16, %s1287_s3 }
 0x1cd   : > { %1167 = vpow2.f32 %v678_v16  ;;  %v1577_v25 = vadd.f32 %v1158_v62, %v607_v19  ;;  %v617_v26 = vpop.f32.mrf.mxu2  ;;  %v1580_v28 = vadd.f32 %v1158_v62, %v612_v20  ;;  %v622_v41 = vpop.f32.mrf.mxu3 }
 0x1ce   : > { %1169 = vtanh.f32 %v1565_v1  ;;  %v1585_v33 = vadd.f32 %v1158_v62, %v617_v26  ;;  %v1601_v53 = vadd.f32 %v1158_v62, %v622_v41  ;;  %p1289_p0 = pnand %p1288_p13, %p1435_p5  ;;  %p1294_p4 = por %p1293_p3, %p1292_p2 }
 0x1cf   : > { %1171 = vtanh.f32 %v1568_v10  ;;  %v663_v31 = vand.u32 2147483647, %v1577_v25  ;;  %v665_v32 = vand.u32 2147483647, %v1580_v28  ;;  %v639_v55 = vmax.f32 %v1577_v25, 0.0 }
 0x1d0   : > { %1173 = vpow2.f32 %v682_v23  ;;  %v667_v49 = vand.u32 2147483647, %v1585_v33  ;;  %v641_v4 = vmax.f32 %v1580_v28, 0.0  ;;  %v669_v19 = vand.u32 2147483647, %v1601_v53  ;;  %p1290_p1 = pneg %p1289_p0 }
 0x1d1   : > { %1175 = vtanh.f32 %v1571_v17  ;;  %v671_v40 = vsub.f32 0.0, %v663_v31  ;;  %v673_v48 = vsub.f32 0.0, %v665_v32  ;;  %vm647_vm6 = vcmp.ne.f32.partialorder %v1577_v25, %v1577_v25 }
 0x1d2   : > { %1177 = vpow2.f32 %v686_v30  ;;  %v675_v5 = vsub.f32 0.0, %v667_v49  ;;  %vm649_vm7 = vcmp.ne.f32.partialorder %v1580_v28, %v1580_v28  ;;  %p1295_p7 = pnand %p1294_p4, %p1290_p1 }
 0x1d3   : > { %v1168_v37 = vpop.eup %1167  ;;  %1179 = vtanh.f32 %v1575_v24  ;;  %v680_v47 = vmul.f32 1.442695, %v671_v40  ;;  %v684_v56 = vmul.f32 1.442695, %v673_v48 }
 0x1d4   : > { %v1593_v42 = vpop.eup %1169  ;;  %v694_v43 = vadd.f32 1.0, %v1168_v37  ;;  %v697_v44 = vmul.f32 -0.5, %v1168_v37  ;;  %1181 = vtanh.f32 %v1577_v25  ;;  %v700_v51 = vand.u32 2147483647, %v1168_v37 }
 0x1d5   : > { %v1596_v46 = vpop.eup %1171  ;;  %v688_v0 = vmul.f32 1.442695, %v675_v5 }
 0x1d6   : > { %v1174_v50 = vpop.eup %1173  ;;  %1183 = vlog2.f32 %v694_v43  ;;  %v698_v6 = vadd.f32 1.0, %v697_v44  ;;  %vm1617_vm14 = vcmp.lt.f32.partialorder %v700_v51, 0.0004427343 }
 0x1d7   : > { %v712_v7 = vadd.f32 1.0, %v1174_v50  ;;  %v715_v12 = vmul.f32 -0.5, %v1174_v50  ;;  %1185 = vpow2.f32 %v690_v45  ;;  %v1605_v13 = vpop.eup %1175  ;;  %v718_v54 = vand.u32 2147483647, %v1174_v50 }
 0x1d8   : > { %1187 = vpow2.f32 %v680_v47  ;;  %v1178_v2 = vpop.eup %1177  ;;  %v699_v62 = vmul.f32 %v1168_v37, %v698_v6 }
 0x1d9   : > { %1189 = vlog2.f32 %v712_v7  ;;  %v716_v3 = vadd.f32 1.0, %v715_v12  ;;  %v1609_v57 = vpop.eup %1179  ;;  %vm1623_vm0 = vcmp.lt.f32.partialorder %v718_v54, 0.0004427343 }
 0x1da   : > { %1191 = vpow2.f32 %v684_v56 }
 0x1db   : > { %1193 = vtanh.f32 %v1580_v28  ;;  %v717_v9 = vmul.f32 %v1174_v50, %v716_v3 }
 0x20e   : > { %v551_v58 = vpop.permute.xlu2 %550  ;;  %v561_v59 = vpop.permute.xlu0 %560 }
 0x20f   : > { %v553_v60 = vsel %vm546_vm9, %v551_v58, 0.0  ;;  %v563_v61 = vsel %vm546_vm9, %v561_v59, 0.0  ;;  %v730_v58 = vadd.f32 1.0, %v1178_v2  ;;  %v733_v59 = vmul.f32 -0.5, %v1178_v2 }
 0x210   : > { %554 = vadd.xlane.f32.xlu1 %v553_v60  ;;  %564 = vadd.xlane.f32.xlu2 %v563_v61  ;;  %v736_v60 = vand.u32 2147483647, %v1178_v2  ;;  %v1614_v61 = vpop.eup %1181 }
 0x211   : > { %v1184_v8 = vpop.eup %1183  ;;  %1195 = vlog2.f32 %v730_v58  ;;  %v734_v14 = vadd.f32 1.0, %v733_v59 }
 0x212   : > { %v1186_v15 = vpop.eup %1185  ;;  %v696_v16 = vmul.f32 0.6931472, %v1184_v8  ;;  %vm1629_vm2 = vcmp.lt.f32.partialorder %v736_v60, 0.0004427343  ;;  %1197 = vpow2.f32 %v688_v0 }
 0x213   : > { %v1188_v20 = vpop.eup %1187  ;;  %v735_v21 = vmul.f32 %v1178_v2, %v734_v14  ;;  %v748_v22 = vadd.f32 1.0, %v1186_v15  ;;  %v751_v23 = vmul.f32 -0.5, %v1186_v15  ;;  %v754_v26 = vand.u32 2147483647, %v1186_v15 }
 0x214   : > { %v1190_v27 = vpop.eup %1189  ;;  %v702_v29 = vsel %vm1617_vm14, %v699_v62, %v696_v16  ;;  %v703_v30 = vadd.f32 1.0, %v1188_v20  ;;  %v706_v31 = vmul.f32 -0.5, %v1188_v20  ;;  %v709_v32 = vand.u32 2147483647, %v1188_v20 }
 0x215   : > { %v1192_v36 = vpop.eup %1191  ;;  %v766_v37 = vadd.f32 %v702_v29, %v638_v35  ;;  %v714_v40 = vmul.f32 0.6931472, %v1190_v27  ;;  %1199 = vlog2.f32 %v748_v22  ;;  %v752_v41 = vadd.f32 1.0, %v751_v23 }
 0x216   : > { %v1638_v43 = vpop.eup %1193  ;;  %vm1642_vm4 = vcmp.lt.f32.partialorder %v754_v26, 0.0004427343  ;;  %1201 = vlog2.f32 %v703_v30  ;;  %v707_v45 = vadd.f32 1.0, %v706_v31  ;;  %vm1646_vm5 = vcmp.lt.f32.partialorder %v709_v32, 0.0004427343 }
 0x217   : > { %v1196_v48 = vpop.eup %1195  ;;  %v774_v35 = vsel %vm646_vm10, %v1565_v1, %v766_v37  ;;  %v720_v49 = vsel %vm1623_vm0, %v717_v9, %v714_v40  ;;  %v753_v50 = vmul.f32 %v1186_v15, %v752_v41  ;;  %v721_v51 = vadd.f32 1.0, %v1192_v36 }
 0x218   : > { %v1198_v6 = vpop.eup %1197  ;;  %v782_v7 = vadd.f32 1e-06, %v774_v35  ;;  %v768_v12 = vadd.f32 %v720_v49, %v640_v38  ;;  %v732_v54 = vmul.f32 0.6931472, %v1196_v48  ;;  %v708_v56 = vmul.f32 %v1188_v20, %v707_v45 }
 0x219   : > { %1203 = vlog2.f32 %v721_v51  ;;  %v724_v2 = vmul.f32 -0.5, %v1192_v36  ;;  %v727_v3 = vand.u32 2147483647, %v1192_v36  ;;  %v739_v5 = vadd.f32 1.0, %v1198_v6 }
 0x21a   : > { %v790_v58 = vsel %vm637_vm11, %v782_v7, 0.0  ;;  %v776_v59 = vsel %vm648_vm12, %v1568_v10, %v768_v12  ;;  %v738_v60 = vsel %vm1629_vm2, %v735_v21, %v732_v54  ;;  %v742_v38 = vmul.f32 -0.5, %v1198_v6 }
 0x21b   : > { %v1200_v62 = vpop.eup %1199  ;;  %v798_v63 = vsel %vm636_vm13, %v1565_v1, %v790_v58  ;;  %v784_v0 = vadd.f32 1e-06, %v776_v59  ;;  %v770_v8 = vadd.f32 %v738_v60, %v642_v39  ;;  %v725_v9 = vadd.f32 1.0, %v724_v2 }
 0x21c   : > { %v1202_v11 = vpop.eup %1201  ;;  %v806_v14 = vsel %vm627_vm15, %v1593_v42, %v798_v63  ;;  %v750_v15 = vmul.f32 0.6931472, %v1200_v62  ;;  %vm1679_vm8 = vcmp.lt.f32.partialorder %v727_v3, 0.0004427343  ;;  %1205 = vlog2.f32 %v739_v5 }
 0x21d   : > { %814 = vst [vmem:[%s1683_s17] sm:$0xff] %v806_v14  ;;  %v792_v1 = vsel %vm637_vm11, %v784_v0, 0.0  ;;  %v778_v39 = vsel %vm650_vm1, %v1571_v17, %v770_v8  ;;  %v705_v42 = vmul.f32 0.6931472, %v1202_v11  ;;  %v726_v18 = vmul.f32 %v1192_v36, %v725_v9 }
 0x21e   : > { %v800_v20 = vsel %vm636_vm13, %v1568_v10, %v792_v1  ;;  %v786_v21 = vadd.f32 1e-06, %v778_v39  ;;  %v756_v22 = vsel %vm1642_vm4, %v753_v50, %v750_v15  ;;  %v743_v23 = vadd.f32 1.0, %v742_v38 }
 0x21f   : > { %v1204_v26 = vpop.eup %1203  ;;  %v808_v27 = vsel %vm627_vm15, %v1596_v46, %v800_v20  ;;  %v772_v29 = vadd.f32 %v756_v22, %v644_v52  ;;  %v711_v30 = vsel %vm1646_vm5, %v708_v56, %v705_v42  ;;  %v745_v31 = vand.u32 2147483647, %v1198_v6 }
 0x220   : > { %816 = vst [vmem:[%s1683_s17 + $0x10] sm:$0xff] %v808_v27  ;;  %v794_v10 = vsel %vm637_vm11, %v786_v21, 0.0  ;;  %v767_v32 = vadd.f32 %v711_v30, %v639_v55  ;;  %v723_v36 = vmul.f32 0.6931472, %v1204_v26  ;;  %v643_v37 = vmax.f32 %v1585_v33, 0.0 }
 0x221   : > { %v802_v46 = vsel %vm636_vm13, %v1571_v17, %v794_v10  ;;  %v780_v52 = vsel %vm652_vm3, %v1575_v24, %v772_v29  ;;  %v744_v40 = vmul.f32 %v1198_v6, %v743_v23  ;;  %vm1717_vm9 = vcmp.lt.f32.partialorder %v745_v31, 0.0004427343 }
 0x222   : > { %v1206_v44 = vpop.eup %1205  ;;  %v810_v55 = vsel %vm627_vm15, %v1605_v13, %v802_v46  ;;  %v788_v45 = vadd.f32 1e-06, %v780_v52  ;;  %v775_v17 = vsel %vm647_vm6, %v1577_v25, %v767_v32  ;;  %v729_v47 = vsel %vm1679_vm8, %v726_v18, %v723_v36 }
 0x223   : > { %818 = vst [vmem:[%s1683_s17 + $0x20] sm:$0xff] %v810_v55  ;;  %v783_v48 = vadd.f32 1e-06, %v775_v17  ;;  %v769_v35 = vadd.f32 %v729_v47, %v641_v4  ;;  %v741_v49 = vmul.f32 0.6931472, %v1206_v44  ;;  %v677_v13 = vsub.f32 0.0, %v669_v19 }
 0x224   : > { %v796_v50 = vsel %vm637_vm11, %v788_v45, 0.0  ;;  %1207 = vtanh.f32 %v1585_v33  ;;  %vm651_vm10 = vcmp.ne.f32.partialorder %v1585_v33, %v1585_v33  ;;  %v645_v11 = vmax.f32 %v1601_v53, 0.0 }
 0x225   : > { %v804_v51 = vsel %vm636_vm13, %v1575_v24, %v796_v50  ;;  %v791_v4 = vsel %vm637_vm11, %v783_v48, 0.0  ;;  %v777_v19 = vsel %vm649_vm7, %v1580_v28, %v769_v35  ;;  %v747_v6 = vsel %vm1717_vm9, %v744_v40, %v741_v49 }
 0x226   : > { %v812_v7 = vsel %vm627_vm15, %v1609_v57, %v804_v51  ;;  %v799_v24 = vsel %vm636_vm13, %v1577_v25, %v791_v4  ;;  %v785_v12 = vadd.f32 1e-06, %v777_v19  ;;  %v771_v54 = vadd.f32 %v747_v6, %v643_v37 }
 0x227   : > { %820 = vst [vmem:[%s1683_s17 + $0x30] sm:$0xff] %v812_v7  ;;  %v807_v56 = vsel %vm627_vm15, %v1614_v61, %v799_v24  ;;  %v692_v2 = vmul.f32 1.442695, %v677_v13  ;;  %vm653_vm14 = vcmp.ne.f32.partialorder %v1601_v53, %v1601_v53 }
 0x228   : > { %815 = vst [vmem:[%s1683_s17 + $0x8] sm:$0xff] %v807_v56  ;;  %v793_v3 = vsel %vm637_vm11, %v785_v12, 0.0  ;;  %v779_v5 = vsel %vm651_vm10, %v1585_v33, %v771_v54 }
 0x229   : > { %v801_v57 = vsel %vm636_vm13, %v1580_v28, %v793_v3  ;;  %v787_v25 = vadd.f32 1e-06, %v779_v5  ;;  %1209 = vpow2.f32 %v692_v2 }
 0x22a   : > { %v1208_v58 = vpop.eup %1207  ;;  %v809_v59 = vsel %vm627_vm15, %v1638_v43, %v801_v57 }
 0x22b   : > { %817 = vst [vmem:[%s1683_s17 + $0x18] sm:$0xff] %v809_v59  ;;  %v795_v61 = vsel %vm637_vm11, %v787_v25, 0.0 }
 0x22c   : > { %v803_v60 = vsel %vm636_vm13, %v1585_v33, %v795_v61 }
 0x22d   : > { %v811_v38 = vsel %vm627_vm15, %v1208_v58, %v803_v60 }
 0x22e   : > { %819 = vst [vmem:[%s1683_s17 + $0x28] sm:$0xff] %v811_v38 }
 0x22f   : > { %v1210_v28 = vpop.eup %1209 }
 0x230   : > { %v757_v62 = vadd.f32 1.0, %v1210_v28  ;;  %v760_v63 = vmul.f32 -0.5, %v1210_v28  ;;  %v763_v43 = vand.u32 2147483647, %v1210_v28 }
 0x232   : > { %1211 = vlog2.f32 %v757_v62  ;;  %v761_v0 = vadd.f32 1.0, %v760_v63  ;;  %vm764_vm12 = vcmp.lt.f32.partialorder %v763_v43, 0.0004427343 }
 0x233   : > { %1213 = vtanh.f32 %v1601_v53 }
 0x234   : > { %v762_v8 = vmul.f32 %v1210_v28, %v761_v0 }
 0x238   : > { %v1212_v9 = vpop.eup %1211 }
 0x239   : > { %v759_v14 = vmul.f32 0.6931472, %v1212_v9  ;;  %v1214_v39 = vpop.eup %1213 }
 0x23b   : > { %v765_v33 = vsel %vm764_vm12, %v762_v8, %v759_v14 }
 0x23c   : > { %v773_v15 = vadd.f32 %v765_v33, %v645_v11 }
 0x23e   : > { %v781_v16 = vsel %vm653_vm14, %v1601_v53, %v773_v15 }
 0x23f   : > { %v789_v1 = vadd.f32 1e-06, %v781_v16 }
 0x241   : > { %v797_v42 = vsel %vm637_vm11, %v789_v1, 0.0 }
 0x242   : > { %v805_v18 = vsel %vm636_vm13, %v1601_v53, %v797_v42 }
 0x243   : > { %v813_v20 = vsel %vm627_vm15, %v1214_v39, %v805_v18 }
 0x244   : > { %821 = vst [vmem:[%s1683_s17 + $0x38] sm:$0xff] %v813_v20 }
 0x245   : > { %1298 = shalt.err (!%p1295_p7)
}
 0x246   : > { %s1343_s26 = smov 128   ;;  %s1344_s6 = smov 8   ;;  %vm557_vm11 = vcmask 7168  }
 0x247   : > { %1104 = dma.vmem_to_hbm [thread:$0]  (%p1435_p5), %s888_s27, 1024, %s890_s0, %s1531_s14, %s1343_s26, %s1343_s26, %s1344_s6  }
 0x248   : > { %p363_p8 = scmp.lt.s32.totalorder %s1416_s13, 2 }
 0x24a   : > { %s1879_s13 = smov (!%p363_p8, %s1416_s13), 2 }
 0x24b   : > { %s1072_s17 = sshll.u32 %s1879_s13, 3 }
 0x24c   : > { %s366_s2 = scalar_lea.vmem %s1843_s7, %s1072_s17  ;;  %s370_s3 = scalar_lea.vmem %s1844_s8, %s1072_s17 }
 0x283   : > { %v555_v34 = vpop.xlane.xlu1 %554  ;;  %v565_v53 = vpop.xlane.xlu2 %564 }
 0x284   : > { %v556_v21 = vmul.f32 0.5, %v555_v34  ;;  %v566_v22 = vmul.f32 0.5, %v565_v53 }
 0x286   : > { %558 = vst.msk [vmem:[%s366_s2] sm:$0xff] %vm557_vm11, %v556_v21 }
 0x287   : > { %567 = vst.msk [vmem:[%s370_s3] sm:$0xff] %vm557_vm11, %v566_v22 }
 0x288 PF: > { %p1118_p5 = scmp.ge.s32.totalorder %s1337_s12, 2  ;;  %s904_s13 = sand.u32 1, %s1325_s30  }
 0x289   : > { %s905_s14 = scalar_lea.sflag [#allocation3], %s904_s13 }
 0x28a   : > { %p1109_p9 = pnand %p1118_p5, %p1439_p6 }
 0x28c   : > { %p1110_p10 = pneg %p1109_p9 }
 0x28e   : > { %1316 = dma.done.wait (%p1110_p10), %s905_s14, 128  }
 0x28f   : > { %1318 = vsyncadd (%p1110_p10), %s905_s14, 4294967168  ;;  %s1873_s19 = sadd.s32 4294967294, %s1337_s12  }
 0x290   : > { %s914_s27 = sand.u32 1, %s1873_s19  }
 0x291   : > { %s915_s0 = scalar_lea.sflag [#allocation5], %s914_s27 }
 0x292   : > { %1320 = dma.done.wait (%p1110_p10), %s915_s0, 1152  }
 0x293   : > { %1322 = vsyncadd (%p1110_p10), %s915_s0, 4294966144  ;;  %p23_p11 = scmp.ge.s32.totalorder %s1420_s15, 5   ;;  %s1874_s30 = smov %s1329_s10 }
 0x294   : > { %s1875_s10 = smov %s1333_s11  ;;  %s1876_s11 = smov %s1433_s18 }
 0x295   : > { %s1877_s12 = smov %s1420_s15  ;;  %25 = sbr.rel (!%p23_p11) target bundleno = 11 (0xb), region = 131 }
 0x29a   :  { %945 = vsyncpa [#allocation3], 1 }
 0x29b   :  { %947 = vsyncpa [#allocation3 + $0x1], 1 }
 0x29c   :  { %948 = vsyncpa [#allocation5], 1 }
 0x29d   :  { %950 = vsyncpa [#allocation5 + $0x1], 1 }

</bundles_post_ra>
